<compile_context>
chip_gen: v5e
topology: v5e:2x2
jax: 0.10.0
libtpu: 0.0.40
codegen_flags: <defaults>
</compile_context>

<pallas_src>
import functools
import math

import jax
import jax.numpy as jnp
from jax import lax
from jax.experimental import pallas as pl
from jax.experimental.pallas import tpu as pltpu


def _proj_kernel(x_ref, w_ref, o_ref):
    # x: (tm, K), w: (tn, K) -> o: (tm, tn) = x @ w.T, f32 accumulation on MXU.
    o_ref[...] = lax.dot_general(
        x_ref[...],
        w_ref[...],
        dimension_numbers=(((1,), (1,)), ((), ())),
        preferred_element_type=jnp.float32,
    ).astype(o_ref.dtype)


@functools.lru_cache(maxsize=1)
def _vmem_capacity_bytes() -> int:
    try:
        return int(pltpu.get_tpu_info().vmem_capacity_bytes)
    except Exception:
        return 64 << 20  # conservative fallback (v7x per-TensorCore VMEM)


def _choose_tiling(M, N, K, x_item, w_item, out_item, tile_m, tile_n):
    """Pick (tm, tn, weight_buffer_count, vmem_limit_bytes)."""
    vmem_cap = _vmem_capacity_bytes()
    headroom = 8 << 20  # Mosaic internal scratch / semaphores / spill margin

    # Row tile: big enough that MXU work per step hides the streamed DMA.
    tile_m = max(8, (tile_m // 8) * 8)
    tm = M if M <= tile_m else tile_m        # multiple of 8, or the full dim

    def budget(tn_, w_bufs):
        return (w_bufs * tn_ * K * w_item        # weight tile(s)
                + 2 * tm * K * x_item            # double-buffered x row-tile
                + 2 * tm * tn_ * out_item        # double-buffered output tile
                + tm * tn_ * 4)                  # f32 MXU result

    if tile_n is not None:
        tile_n = max(128, (tile_n // 128) * 128)
        tn, w_bufs = (N if N <= tile_n else tile_n), 2
    elif budget(N, 2) + headroom <= vmem_cap:
        # Whole weight resident in VMEM (v5e/v6e, 128 MiB): HBM-read once.
        tn, w_bufs = N, 2
    elif budget(N, 1) + headroom <= vmem_cap:
        # Resident only if single-buffered; its block index never changes,
        # so one buffer is sufficient.
        tn, w_bufs = N, 1
    else:
        # Stream 1024-wide (256-aligned, lane-dense) weight column tiles (v7x).
        tn, w_bufs = (N if N <= 1024 else 1024), 2

    vmem_limit = int(min(max(budget(tn, w_bufs) + (4 << 20), 16 << 20),
                         vmem_cap - (4 << 20)))
    return tm, tn, w_bufs, vmem_limit


@functools.partial(jax.jit, static_argnames=("tm", "tn", "w_bufs", "vmem_limit"))
def _projection_call(x2, w, *, tm, tn, w_bufs, vmem_limit):
    M, K = x2.shape
    N = w.shape[0]
    # Weight tiles on the OUTER axis, row tiles on the INNER axis: the weight
    # index_map is constant along the inner axis, so each weight tile is
    # fetched from HBM exactly once while x (much smaller) is re-streamed.
    grid = (pl.cdiv(N, tn), pl.cdiv(M, tm))

    w_spec_kwargs = {}
    if w_bufs == 1:
        w_spec_kwargs["pipeline_mode"] = pl.Buffered(1)
    w_spec = pl.BlockSpec((tn, K), lambda j, i: (j, 0), **w_spec_kwargs)

    x_item = x2.dtype.itemsize
    w_item = w.dtype.itemsize

    return pl.pallas_call(
        _proj_kernel,
        out_shape=jax.ShapeDtypeStruct((M, N), x2.dtype),
        grid=grid,
        in_specs=[
            pl.BlockSpec((tm, K), lambda j, i: (i, 0)),   # x row tile (streamed)
            w_spec,                                       # weight tile (native (N,K))
        ],
        out_specs=pl.BlockSpec((tm, tn), lambda j, i: (i, j)),
        compiler_params=pltpu.CompilerParams(
            dimension_semantics=("parallel", "parallel"),
            vmem_limit_bytes=vmem_limit,
        ),
        cost_estimate=pl.CostEstimate(
            flops=2 * M * N * K,
            transcendentals=0,
            bytes_accessed=(M * K * x_item * pl.cdiv(N, tn)   # x re-streamed per N tile
                            + K * N * w_item                  # weight read once
                            + M * N * x_item),                # output written once
        ),
    )(x2, w)


def idefics3_simple_mlp(x, proj_weight, *, tile_m=512, tile_n=None):
    """Bias-free modality projection: x @ proj_weight.T.

    x:           (..., input_size)
    proj_weight: (output_size, input_size)   -- native nn.Linear layout (no transpose)
    returns:     (..., output_size)
    """
    *lead, K = x.shape
    N, K_w = proj_weight.shape
    if K != K_w:
        raise ValueError(f"feature-dim mismatch: x has {K}, weight has {K_w}")

    # The production module stores the weight in the activation dtype (bf16);
    # only cast if a caller hands mismatched dtypes.
    if proj_weight.dtype != x.dtype:
        proj_weight = proj_weight.astype(x.dtype)

    M = math.prod(lead) if lead else 1
    item = jnp.dtype(x.dtype).itemsize
    tm, tn, w_bufs, vmem_limit = _choose_tiling(
        M, N, K, item, item, item, tile_m, tile_n)

    x2 = x.reshape(M, K)
    out = _projection_call(x2, proj_weight,
                           tm=tm, tn=tn, w_bufs=w_bufs, vmem_limit=vmem_limit)
    return out.reshape(*lead, N)


def _reference(x, proj_weight):
    return jnp.einsum("...k,nk->...n",
                      x.astype(jnp.float32),
                      proj_weight.astype(jnp.float32)).astype(x.dtype)


if __name__ == "__main__":
    # Small synthetic config consistent with the module:
    #   vision hidden_size = 32, scale_factor = 2 -> input_size = 128
    #   text hidden_size (output_size) = 256
    B, S = 2, 8
    INPUT_SIZE = 32 * 2 ** 2     # 128
    OUTPUT_SIZE = 256

    key = jax.random.PRNGKey(0)
    k_x, k_w = jax.random.split(key)

    x = jax.random.normal(k_x, (B, S, INPUT_SIZE), dtype=jnp.float32)
    # nn.Linear weight layout: (output_size, input_size)
    proj_weight = 0.02 * jax.random.normal(
        k_w, (OUTPUT_SIZE, INPUT_SIZE), dtype=jnp.float32)

    out = jax.block_until_ready(idefics3_simple_mlp(x, proj_weight))
    ref = _reference(x, proj_weight)

    assert out.shape == (B, S, OUTPUT_SIZE)
    err = float(jnp.max(jnp.abs(out.astype(jnp.float32) - ref.astype(jnp.float32))))
    assert jnp.allclose(out, ref, atol=1e-3, rtol=1e-3), (
        f"mismatch vs reference: max abs err {err:.3e}")

    print("KERNEL_OK")
</pallas_src>

<mosaic_0001>
module attributes {stable_mosaic.version = 11 : i64} {
  func.func @_proj_kernel(%arg0: i32, %arg1: i32, %arg2: memref<16x128xf32, #tpu.memory_space<vmem>>, %arg3: memref<256x128xf32, #tpu.memory_space<vmem>>, %arg4: memref<16x256xf32, #tpu.memory_space<vmem>>) attributes {dimension_semantics = [#tpu.dimension_semantics<parallel>, #tpu.dimension_semantics<parallel>], iteration_bounds = array<i64: 1, 1>, scalar_prefetch = 0 : i64, scratch_operands = 0 : i64, tpu.core_type = #tpu.core_type<tc>, window_params = [{transform_indices = @transform_0, window_bounds = array<i64: 16, 128>}, {transform_indices = @transform_1, window_bounds = array<i64: 256, 128>}, {transform_indices = @transform_2, window_bounds = array<i64: 16, 256>}]} {
    %c0 = arith.constant 0 : index
    %c0_0 = arith.constant 0 : index
    %0 = vector.load %arg2[%c0, %c0_0] : memref<16x128xf32, #tpu.memory_space<vmem>>, vector<16x128xf32>
    %c0_1 = arith.constant 0 : index
    %c0_2 = arith.constant 0 : index
    %1 = vector.load %arg3[%c0_1, %c0_2] : memref<256x128xf32, #tpu.memory_space<vmem>>, vector<256x128xf32>
    %cst = arith.constant dense<0.000000e+00> : vector<16x256xf32>
    %2 = tpu.matmul %0, %1, %cst {dimension_numbers = #tpu.dot_dimension_numbers<[1], [1], [0], [0], [0, 0, 1, 0], [], []>} : vector<16x128xf32>, vector<256x128xf32>, vector<16x256xf32> -> vector<16x256xf32>
    %c0_3 = arith.constant 0 : index
    %c0_4 = arith.constant 0 : index
    %3 = vector.load %arg4[%c0_3, %c0_4] : memref<16x256xf32, #tpu.memory_space<vmem>>, vector<16x256xf32>
    tpu.vector_store %arg4[%c0_3, %c0_4], %2 {strides = array<i32>} : memref<16x256xf32, #tpu.memory_space<vmem>>, vector<16x256xf32>,
    return
  }
  func.func @transform_0(%arg0: i32, %arg1: i32) -> (i32, i32) {
    %c0_i32 = arith.constant 0 : i32
    %c0_i32_0 = arith.constant 0 : i32
    return %arg1, %c0_i32 : i32, i32
  }
  func.func @transform_1(%arg0: i32, %arg1: i32) -> (i32, i32) {
    %c0_i32 = arith.constant 0 : i32
    %c0_i32_0 = arith.constant 0 : i32
    return %arg0, %c0_i32 : i32, i32
  }
  func.func @transform_2(%arg0: i32, %arg1: i32) -> (i32, i32) {
    %c0_i32 = arith.constant 0 : i32
    return %arg1, %arg0 : i32, i32
  }
}

</mosaic_0001>

<bundles_post_ra>
// kernel: _projection_call.1
= control target key start
LH: loop header
LB: loop body
LE: loop exit
PB: predicated region body
PF: predicated region fallthrough
CT: control target
= control target key end

     0   :  { %7 = vsyncpa [#allocation3], 0  ;;  %s296_s0 = inlined_call_operand.hbm [shape: f32[16,128], index: 0, kind: input, shape index: {}]   ;;  %s297_s1 = inlined_call_operand.hbm [shape: f32[256,128], index: 1, kind: input, shape index: {}]   ;;  %s298_s2 = inlined_call_operand.hbm [shape: f32[16,256], index: 2, kind: output, shape index: {}]  }
   0x1   :  { %8 = vsyncpa [#allocation6], 0 }
   0x2   :  { %9 = vsyncpa [#allocation4], 0  ;;  %s14_s11 = sshll.u32 %s296_s0, 4  ;;  %s265_s12 = smov [#allocation2]   ;;  %s15_s11 = int_to_ptr.hbm [resolvable:$true] %s14_s11 }
   0x3   :  { %s16_s13 = sshll.u32 %s265_s12, 4  ;;  %s27_s16 = sshll.u32 %s297_s1, 4  ;;  %s17_s13 = int_to_ptr.vmem [resolvable:$true] %s16_s13  ;;  %s28_s16 = int_to_ptr.hbm [resolvable:$true] %s27_s16 }
   0x4   :  { %s266_s17 = smov 128   ;;  %s267_s18 = smov 8  }
   0x5   :  { %22 = dma.hbm_to_vmem [thread:$0]  %s15_s11, 256, %s17_s13, [#allocation3], %s266_s17, %s266_s17, %s267_s18  }
   0x6   :  { %s268_s19 = smov [#allocation5]  }
   0x7   :  { %s29_s20 = sshll.u32 %s268_s19, 4  ;;  %s30_s20 = int_to_ptr.vmem [resolvable:$true] %s29_s20 }
   0x8   :  { %35 = dma.hbm_to_vmem [thread:$0]  %s28_s16, 4096, %s30_s20, [#allocation6], %s266_s17, %s266_s17, %s267_s18  }
   0x9   :  { %259 = dma.done.wait [#allocation3], 256  }
   0xa   :  { %260 = vsyncadd [#allocation3], 4294967040 }
   0xb   :  { %261 = dma.done.wait [#allocation6], 4096  }
   0xc   :  { %262 = vsyncadd [#allocation6], 4294963200  ;;  %v61_v0 = vld [vmem:[#allocation5 + $0x78] sm:$0xff]  ;;  %v60_v2 = vld [vmem:[#allocation5 + $0x70] sm:$0xff]  ;;  %s269_s0 = smov [#allocation7]   ;;  %s134_s23 = sshll.u32 %s298_s2, 4  ;;  %s135_s23 = int_to_ptr.hbm [resolvable:$true] %s134_s23 }
   0xd   :  { %v77_v1 = vld [vmem:[#allocation5 + $0xf8] sm:$0xff]  ;;  %148 = vmatpush.xpose.msra.mxu2 %v61_v0  ;;  %v76_v3 = vld [vmem:[#allocation5 + $0xf0] sm:$0xff]  ;;  %78 = vmatpush.xpose.msra.mxu0 %v61_v0  ;;  %v59_v4 = vld [vmem:[#allocation5 + $0x68] sm:$0xff]  ;;  %s132_s1 = sshll.u32 %s269_s0, 4  ;;  %s270_s24 = smov 256   ;;  %s133_s1 = int_to_ptr.vmem [resolvable:$true] %s132_s1 }
   0xe   :  { %164 = vmatpush.xpose.msra.mxu3 %v77_v1  ;;  %101 = vmatpush.xpose.msra.mxu1 %v77_v1  ;;  %v75_v5 = vld [vmem:[#allocation5 + $0xe8] sm:$0xff]  ;;  %v58_v6 = vld [vmem:[#allocation5 + $0x60] sm:$0xff]  ;;  %v57_v8 = vld [vmem:[#allocation5 + $0x58] sm:$0xff]  ;;  %s271_s25 = smov 16  }
   0xf   :  { %v74_v7 = vld [vmem:[#allocation5 + $0xe0] sm:$0xff]  ;;  %v73_v9 = vld [vmem:[#allocation5 + $0xd8] sm:$0xff]  ;;  %v56_v10 = vld [vmem:[#allocation5 + $0x50] sm:$0xff] }
  0x10   :  { %v72_v11 = vld [vmem:[#allocation5 + $0xd0] sm:$0xff]  ;;  %v55_v12 = vld [vmem:[#allocation5 + $0x48] sm:$0xff]  ;;  %v54_v14 = vld [vmem:[#allocation5 + $0x40] sm:$0xff] }
  0x11   :  { %149 = vmatpush.xpose.msra.mxu2 %v60_v2  ;;  %79 = vmatpush.xpose.msra.mxu0 %v60_v2  ;;  %v71_v13 = vld [vmem:[#allocation5 + $0xc8] sm:$0xff]  ;;  %v70_v15 = vld [vmem:[#allocation5 + $0xc0] sm:$0xff]  ;;  %v53_v16 = vld [vmem:[#allocation5 + $0x38] sm:$0xff] }
  0x12   :  { %165 = vmatpush.xpose.msra.mxu3 %v76_v3  ;;  %102 = vmatpush.xpose.msra.mxu1 %v76_v3  ;;  %v69_v17 = vld [vmem:[#allocation5 + $0xb8] sm:$0xff]  ;;  %v52_v18 = vld [vmem:[#allocation5 + $0x30] sm:$0xff]  ;;  %v51_v20 = vld [vmem:[#allocation5 + $0x28] sm:$0xff] }
  0x13   :  { %v68_v19 = vld [vmem:[#allocation5 + $0xb0] sm:$0xff]  ;;  %v67_v21 = vld [vmem:[#allocation5 + $0xa8] sm:$0xff]  ;;  %v50_v22 = vld [vmem:[#allocation5 + $0x20] sm:$0xff] }
  0x14   :  { %v66_v23 = vld [vmem:[#allocation5 + $0xa0] sm:$0xff]  ;;  %v49_v24 = vld [vmem:[#allocation5 + $0x18] sm:$0xff]  ;;  %v48_v26 = vld [vmem:[#allocation5 + $0x10] sm:$0xff] }
  0x15   :  { %150 = vmatpush.xpose.msra.mxu2 %v59_v4  ;;  %80 = vmatpush.xpose.msra.mxu0 %v59_v4  ;;  %v65_v25 = vld [vmem:[#allocation5 + $0x98] sm:$0xff]  ;;  %v64_v27 = vld [vmem:[#allocation5 + $0x90] sm:$0xff]  ;;  %v47_v28 = vld [vmem:[#allocation5 + $0x8] sm:$0xff] }
  0x16   :  { %166 = vmatpush.xpose.msra.mxu3 %v75_v5  ;;  %103 = vmatpush.xpose.msra.mxu1 %v75_v5  ;;  %v63_v29 = vld [vmem:[#allocation5 + $0x88] sm:$0xff]  ;;  %v46_v30 = vld [vmem:[#allocation5] sm:$0xff]  ;;  %v45_v32 = vld [vmem:[#allocation2 + $0x8] sm:$0xff] }
  0x17   :  { %v62_v31 = vld [vmem:[#allocation5 + $0x80] sm:$0xff]  ;;  %v44_v33 = vld [vmem:[#allocation2] sm:$0xff] }
  0x19   :  { %151 = vmatpush.xpose.msra.mxu2 %v58_v6  ;;  %81 = vmatpush.xpose.msra.mxu0 %v58_v6 }
  0x1a   :  { %167 = vmatpush.xpose.msra.mxu3 %v74_v7  ;;  %104 = vmatpush.xpose.msra.mxu1 %v74_v7 }
  0x1d   :  { %152 = vmatpush.xpose.msra.mxu2 %v57_v8  ;;  %82 = vmatpush.xpose.msra.mxu0 %v57_v8 }
  0x1e   :  { %168 = vmatpush.xpose.msra.mxu3 %v73_v9  ;;  %105 = vmatpush.xpose.msra.mxu1 %v73_v9 }
  0x21   :  { %153 = vmatpush.xpose.msra.mxu2 %v56_v10  ;;  %83 = vmatpush.xpose.msra.mxu0 %v56_v10 }
  0x22   :  { %169 = vmatpush.xpose.msra.mxu3 %v72_v11  ;;  %106 = vmatpush.xpose.msra.mxu1 %v72_v11 }
  0x25   :  { %154 = vmatpush.xpose.msra.mxu2 %v55_v12  ;;  %84 = vmatpush.xpose.msra.mxu0 %v55_v12 }
  0x26   :  { %170 = vmatpush.xpose.msra.mxu3 %v71_v13  ;;  %107 = vmatpush.xpose.msra.mxu1 %v71_v13 }
  0x29   :  { %155 = vmatpush.xpose.msra.mxu2 %v54_v14  ;;  %85 = vmatpush.xpose.msra.mxu0 %v54_v14 }
  0x2a   :  { %171 = vmatpush.xpose.msra.mxu3 %v70_v15  ;;  %108 = vmatpush.xpose.msra.mxu1 %v70_v15 }
  0x2d   :  { %156 = vmatpush.xpose.msra.mxu2 %v53_v16  ;;  %86 = vmatpush.xpose.msra.mxu0 %v53_v16 }
  0x2e   :  { %172 = vmatpush.xpose.msra.mxu3 %v69_v17  ;;  %109 = vmatpush.xpose.msra.mxu1 %v69_v17 }
  0x31   :  { %157 = vmatpush.xpose.msra.mxu2 %v52_v18  ;;  %87 = vmatpush.xpose.msra.mxu0 %v52_v18 }
  0x32   :  { %173 = vmatpush.xpose.msra.mxu3 %v68_v19  ;;  %110 = vmatpush.xpose.msra.mxu1 %v68_v19 }
  0x35   :  { %158 = vmatpush.xpose.msra.mxu2 %v51_v20  ;;  %88 = vmatpush.xpose.msra.mxu0 %v51_v20 }
  0x36   :  { %174 = vmatpush.xpose.msra.mxu3 %v67_v21  ;;  %111 = vmatpush.xpose.msra.mxu1 %v67_v21 }
  0x39   :  { %159 = vmatpush.xpose.msra.mxu2 %v50_v22  ;;  %89 = vmatpush.xpose.msra.mxu0 %v50_v22 }
  0x3a   :  { %175 = vmatpush.xpose.msra.mxu3 %v66_v23  ;;  %112 = vmatpush.xpose.msra.mxu1 %v66_v23 }
  0x3d   :  { %160 = vmatpush.xpose.msra.mxu2 %v49_v24  ;;  %90 = vmatpush.xpose.msra.mxu0 %v49_v24 }
  0x3e   :  { %176 = vmatpush.xpose.msra.mxu3 %v65_v25  ;;  %113 = vmatpush.xpose.msra.mxu1 %v65_v25 }
  0x41   :  { %161 = vmatpush.xpose.msra.mxu2 %v48_v26  ;;  %91 = vmatpush.xpose.msra.mxu0 %v48_v26 }
  0x42   :  { %177 = vmatpush.xpose.msra.mxu3 %v64_v27  ;;  %114 = vmatpush.xpose.msra.mxu1 %v64_v27 }
  0x45   :  { %162 = vmatpush.xpose.msra.mxu2 %v47_v28  ;;  %92 = vmatpush.xpose.msra.mxu0 %v47_v28 }
  0x46   :  { %178 = vmatpush.xpose.msra.mxu3 %v63_v29  ;;  %115 = vmatpush.xpose.msra.mxu1 %v63_v29 }
  0x49   :  { %163 = vmatpush.xpose.msra.mxu2 %v46_v30  ;;  %93 = vmatpush.xpose.msra.mxu0 %v46_v30 }
  0x4a   :  { %179 = vmatpush.xpose.msra.mxu3 %v62_v31  ;;  %116 = vmatpush.xpose.msra.mxu1 %v62_v31 }
  0x4c   :  { %97 = vmatmul.f32.vlgmr.msra.gmra.mxu2 %v45_v32  ;;  %94 = vmatmul.f32.vlgmr.msra.gmra.mxu0 %v44_v33 }
  0x4d   :  { %120 = vmatmul.f32.vlgmr.msra.gmra.mxu3 %v45_v32  ;;  %117 = vmatmul.f32.vlgmr.msra.gmra.mxu1 %v44_v33 }
  0xc9   :  { %v95_v34 = vpop.f32.mrf.mxu0 }
  0xca   :  { %v118_v35 = vpop.f32.mrf.mxu1  ;;  %124 = vst [vmem:[#allocation7] sm:$0xff] %v95_v34 }
  0xcb   :  { %125 = vst [vmem:[#allocation7 + $0x8] sm:$0xff] %v118_v35 }
  0xcf   :  { %v98_v36 = vpop.f32.mrf.mxu2 }
  0xd0   :  { %v121_v37 = vpop.f32.mrf.mxu3  ;;  %126 = vst [vmem:[#allocation7 + $0x10] sm:$0xff] %v98_v36 }
  0xd1   :  { %127 = vst [vmem:[#allocation7 + $0x18] sm:$0xff] %v121_v37 }
  0xd2   :  { %140 = dma.vmem_to_hbm [thread:$0]  %s133_s1, 512, %s135_s23, [#allocation4], %s270_s24, %s270_s24, %s271_s25  }
  0xd3   :  { %263 = dma.done.wait [#allocation4], 512  }
  0xd4   :  { %264 = vsyncadd [#allocation4], 4294966784 }
  0xd5   :  { %145 = vsyncpa [#allocation3], 1 }
  0xd6   :  { %146 = vsyncpa [#allocation6], 1 }
  0xd7   :  { %147 = vsyncpa [#allocation4], 1 }

</bundles_post_ra>
